<compile_context>
chip_gen: v6e
topology: v6e:2x2x1
jax: 0.10.0
libtpu: 0.0.40
codegen_flags: <defaults>
</compile_context>

<pallas_src>
import math

import jax
import jax.numpy as jnp
from jax import lax
from jax.experimental import pallas as pl
from jax.experimental.pallas import tpu as pltpu

# ---------------------------------------------------------------------------
# configuration (small, deterministic shapes)
# ---------------------------------------------------------------------------
B = 2            # batch
S = 8            # max_len
D = 32           # d_model
H = 4            # attention heads
DH = D // H      # head dim
BS = B * S       # flattened query rows            = 16
C = H * BS       # flattened (head, batch, key) axis = 64
LN_EPS = 1e-5    # PyTorch nn.LayerNorm default
NEG_INF = -1e30

# ---- packed-parameter slab layout (width 128, row starts multiples of 8) ----
_R_WQKV = 0      # rows   0:32   cols 0:96   [wq | wk | wv]
_R_BQKV = 32     # row   32      cols 0:96   [bq | bk | bv]
_R_BO = 33       # row   33      cols 0:32
_R_G1 = 34       # row   34      cols 0:32   norm1 gamma
_R_B1 = 35       # row   35      cols 0:32   norm1 beta
_R_BF = 36       # row   36      cols 0:32   ffn bias
_R_G2 = 37       # row   37      cols 0:32   norm2 gamma
_R_B2 = 38       # row   38      cols 0:32   norm2 beta
_R_WO = 40       # rows  40:72   cols 0:32
_R_WF = 72       # rows  72:104  cols 0:32
_R_HM = 104      # rows 104:168  cols 0:32   per-head column mask (C, D)
_R_SEG = 168     # rows 168:232  cols 0:64   block-ones matrix     (C, C)
SLAB_ROWS = 232


# ---------------------------------------------------------------------------
# Pallas kernel: one grid step == whole layer, all batches & heads fused
# ---------------------------------------------------------------------------
def _layer_norm(x, gamma, beta):
    mu = jnp.mean(x, axis=-1, keepdims=True)
    var = jnp.mean((x - mu) * (x - mu), axis=-1, keepdims=True)
    return (x - mu) * lax.rsqrt(var + LN_EPS) * gamma + beta


def transformer_layer_kernel(x_ref, bias_ref, slab_ref, o_ref):
    x = x_ref[...]                                         # (BS, D)  f32
    bias = bias_ref[...]                                   # (BS, C)  additive mask

    # static slices of the packed parameter slab (free)
    w_qkv = slab_ref[_R_WQKV:_R_WQKV + D, 0:3 * D]         # (D, 3D)
    b_qkv = slab_ref[_R_BQKV:_R_BQKV + 1, 0:3 * D]         # (1, 3D)
    wo = slab_ref[_R_WO:_R_WO + D, 0:D]
    bo = slab_ref[_R_BO:_R_BO + 1, 0:D]
    g1 = slab_ref[_R_G1:_R_G1 + 1, 0:D]
    be1 = slab_ref[_R_B1:_R_B1 + 1, 0:D]
    wf = slab_ref[_R_WF:_R_WF + D, 0:D]
    bf = slab_ref[_R_BF:_R_BF + 1, 0:D]
    g2 = slab_ref[_R_G2:_R_G2 + 1, 0:D]
    be2 = slab_ref[_R_B2:_R_B2 + 1, 0:D]
    hmask = slab_ref[_R_HM:_R_HM + C, 0:D]                 # (C, D)
    seg = slab_ref[_R_SEG:_R_SEG + C, 0:C]                 # (C, C)

    # ---- fused QKV projection: one MXU push instead of three -------------
    qkv = jnp.dot(x, w_qkv, preferred_element_type=jnp.float32) + b_qkv    # (BS, 3D)
    q = qkv[:, 0:D]
    k = qkv[:, D:2 * D]
    v = qkv[:, 2 * D:3 * D]

    # ---- all-heads / all-batches attention (block formulation) -----------
    # Row c of kblk/vblk is key row (c % BS) masked to head (c // BS)'s columns,
    # so q @ kblk^T gives every per-head score in one matmul.
    kblk = jnp.concatenate([k] * H, axis=0) * hmask        # (C, D)
    vblk = jnp.concatenate([v] * H, axis=0) * hmask        # (C, D)

    scale = 1.0 / math.sqrt(DH)
    s = lax.dot_general(q, kblk,
                        dimension_numbers=(((1,), (1,)), ((), ())),
                        preferred_element_type=jnp.float32)                # (BS, C)
    s = s * scale + bias            # padded keys / other-batch keys -> -1e30

    # softmax per (batch, head) block; a single per-row max is a valid stabiliser
    # because softmax is shift-invariant (masked entries underflow to exactly 0).
    m = jnp.max(s, axis=-1, keepdims=True)
    e = jnp.exp(s - m)
    lsum = jnp.dot(e, seg, preferred_element_type=jnp.float32)             # (BS, C)
    # clamp keeps cross-batch (all-zero) blocks at p == 0 instead of NaN;
    # assumes every sequence has >= 1 valid token (same as the reference).
    p = e * pl.reciprocal(jnp.maximum(lsum, 1e-30), approx=True)

    # p @ vblk directly yields the head-concatenated context: no concat, no slices.
    att = jnp.dot(p, vblk, preferred_element_type=jnp.float32)             # (BS, D)
    att = jnp.dot(att, wo, preferred_element_type=jnp.float32) + bo

    # ---- residual + norm1, FFN (Linear->ReLU->Dropout(identity)), norm2 ---
    x1 = _layer_norm(att + x, g1, be1)
    ff = jnp.maximum(jnp.dot(x1, wf, preferred_element_type=jnp.float32) + bf, 0.0)
    out = _layer_norm(x1 + ff, g2, be2)

    o_ref[...] = out.astype(o_ref.dtype)


# ---------------------------------------------------------------------------
# wrapper: pack params/constants into one slab, precompute the additive mask
# ---------------------------------------------------------------------------
def _pack_slab(params):
    # per-head column mask: hmask[c, d] = 1 iff column d belongs to head (c // BS)
    hm = (jnp.arange(C)[:, None] // BS) == (jnp.arange(D)[None, :] // DH)
    # block-ones: seg[c, c'] = 1 iff c, c' belong to the same (head, batch) block
    blk = jnp.arange(C) // S
    seg = blk[:, None] == blk[None, :]

    w_qkv = jnp.concatenate([params["wq"], params["wk"], params["wv"]], axis=1)
    b_qkv = jnp.concatenate([params["bq"], params["bk"], params["bv"]], axis=1)

    slab = jnp.zeros((SLAB_ROWS, 128), jnp.float32)
    slab = slab.at[_R_WQKV:_R_WQKV + D, 0:3 * D].set(w_qkv)
    slab = slab.at[_R_BQKV, 0:3 * D].set(b_qkv[0])
    slab = slab.at[_R_BO, 0:D].set(params["bo"][0])
    slab = slab.at[_R_G1, 0:D].set(params["ln1_g"][0])
    slab = slab.at[_R_B1, 0:D].set(params["ln1_b"][0])
    slab = slab.at[_R_BF, 0:D].set(params["ffn_b"][0])
    slab = slab.at[_R_G2, 0:D].set(params["ln2_g"][0])
    slab = slab.at[_R_B2, 0:D].set(params["ln2_b"][0])
    slab = slab.at[_R_WO:_R_WO + D, 0:D].set(params["wo"])
    slab = slab.at[_R_WF:_R_WF + D, 0:D].set(params["ffn_w"])
    slab = slab.at[_R_HM:_R_HM + C, 0:D].set(hm.astype(jnp.float32))
    slab = slab.at[_R_SEG:_R_SEG + C, 0:C].set(seg.astype(jnp.float32))
    return slab


def _mask_bias(mask):
    # additive bias (BS, C): 0 where (query batch == key batch AND key is valid),
    # else -1e30.  Column c = head*(B*S) + key_row.
    valid = (mask > 0).reshape(-1)                         # (BS,)
    row_b = jnp.arange(BS) // S                            # query batch per row
    col_r = jnp.arange(C) % BS                             # key row per column
    col_b = col_r // S                                     # key batch per column
    ok = (row_b[:, None] == col_b[None, :]) & valid[col_r][None, :]
    return jnp.where(ok, 0.0, NEG_INF).astype(jnp.float32)


@jax.jit
def transformer_layer(x, mask, params):
    x2 = x.reshape(BS, D).astype(jnp.float32)
    bias = _mask_bias(mask)
    slab = _pack_slab(params)

    out2 = pl.pallas_call(
        transformer_layer_kernel,
        out_shape=jax.ShapeDtypeStruct((BS, D), jnp.float32),
        grid_spec=pltpu.PrefetchScalarGridSpec(
            num_scalar_prefetch=0,
            grid=(1,),                                     # single fused step
            in_specs=[
                pl.BlockSpec((BS, D), lambda i: (0, 0)),           # activations
                pl.BlockSpec((BS, C), lambda i: (0, 0)),           # mask bias
                pl.BlockSpec((SLAB_ROWS, 128), lambda i: (0, 0)),  # packed params
            ],
            out_specs=pl.BlockSpec((BS, D), lambda i: (0, 0)),
        ),
        compiler_params=pltpu.CompilerParams(
            dimension_semantics=("arbitrary",)),
    )(x2, bias, slab)
    return out2.reshape(B, S, D)


# ---------------------------------------------------------------------------
# pure-JAX reference (same math) for a sanity check
# ---------------------------------------------------------------------------
def reference(x, mask, p):
    km = (mask > 0).astype(jnp.float32)[:, None, None, :]            # (B,1,1,S)
    residual = x
    q = x @ p["wq"] + p["bq"]
    k = x @ p["wk"] + p["bk"]
    v = x @ p["wv"] + p["bv"]
    qh = q.reshape(B, S, H, DH).transpose(0, 2, 1, 3)
    kh = k.reshape(B, S, H, DH).transpose(0, 2, 1, 3)
    vh = v.reshape(B, S, H, DH).transpose(0, 2, 1, 3)
    scores = jnp.einsum("bhqd,bhkd->bhqk", qh, kh) / math.sqrt(DH)
    scores = jnp.where(km > 0.0, scores, NEG_INF)
    att = jax.nn.softmax(scores, axis=-1)
    o = jnp.einsum("bhqk,bhkd->bhqd", att, vh).transpose(0, 2, 1, 3).reshape(B, S, D)
    o = o @ p["wo"] + p["bo"]

    def ln(y, g, bta):
        mu = y.mean(-1, keepdims=True)
        var = ((y - mu) ** 2).mean(-1, keepdims=True)
        return (y - mu) * lax.rsqrt(var + LN_EPS) * g + bta

    x1 = ln(o + residual, p["ln1_g"], p["ln1_b"])
    ff = jnp.maximum(x1 @ p["ffn_w"] + p["ffn_b"], 0.0)
    return ln(x1 + ff, p["ln2_g"], p["ln2_b"])


# ---------------------------------------------------------------------------
# main
# ---------------------------------------------------------------------------
if __name__ == "__main__":
    key = jax.random.PRNGKey(0)
    keys = jax.random.split(key, 12)
    std = 1.0 / math.sqrt(D)

    # weights stored input-major (x @ W), i.e. transposed vs. PyTorch nn.Linear
    params = {
        "wq": jax.random.normal(keys[0], (D, D), jnp.float32) * std,
        "bq": jax.random.normal(keys[1], (1, D), jnp.float32) * 0.01,
        "wk": jax.random.normal(keys[2], (D, D), jnp.float32) * std,
        "bk": jax.random.normal(keys[3], (1, D), jnp.float32) * 0.01,
        "wv": jax.random.normal(keys[4], (D, D), jnp.float32) * std,
        "bv": jax.random.normal(keys[5], (1, D), jnp.float32) * 0.01,
        "wo": jax.random.normal(keys[6], (D, D), jnp.float32) * std,
        "bo": jax.random.normal(keys[7], (1, D), jnp.float32) * 0.01,
        "ln1_g": jnp.ones((1, D), jnp.float32),
        "ln1_b": jnp.zeros((1, D), jnp.float32),
        "ffn_w": jax.random.normal(keys[8], (D, D), jnp.float32) * std,
        "ffn_b": jax.random.normal(keys[9], (1, D), jnp.float32) * 0.01,
        "ln2_g": jnp.ones((1, D), jnp.float32),
        "ln2_b": jnp.zeros((1, D), jnp.float32),
    }

    x = jax.random.normal(keys[10], (B, S, D), jnp.float32)
    lengths = jnp.array([S, 5], dtype=jnp.int32)                       # 2nd sequence padded
    mask = (jnp.arange(S)[None, :] < lengths[:, None]).astype(jnp.float32)  # (B, S)

    out = transformer_layer(x, mask, params)
    out = jax.block_until_ready(out)

    ref = reference(x, mask, params)
    assert out.shape == (B, S, D)
    # tolerance loosened vs 1e-4 because the softmax uses the approximate EUP
    # reciprocal (pl.reciprocal(approx=True)); real bugs would be O(0.1-1).
    assert jnp.allclose(out, ref, rtol=5e-3, atol=5e-3), "mismatch vs reference"

    print("KERNEL_OK")
</pallas_src>

<mosaic_0001>
module attributes {stable_mosaic.version = 11 : i64} {
  func.func @transformer_layer_kernel(%arg0: i32, %arg1: memref<16x32xf32, #tpu.memory_space<vmem>>, %arg2: memref<16x64xf32, #tpu.memory_space<vmem>>, %arg3: memref<232x128xf32, #tpu.memory_space<vmem>>, %arg4: memref<16x32xf32, #tpu.memory_space<vmem>>) attributes {dimension_semantics = [#tpu.dimension_semantics<arbitrary>], iteration_bounds = array<i64: 1>, scalar_prefetch = 0 : i64, scratch_operands = 0 : i64, tpu.core_type = #tpu.core_type<tc>, window_params = [{pipeline_mode = #tpu.pipeline_mode<synchronous>, transform_indices = @transform_0, window_bounds = array<i64: 16, 32>}, {pipeline_mode = #tpu.pipeline_mode<synchronous>, transform_indices = @transform_1, window_bounds = array<i64: 16, 64>}, {pipeline_mode = #tpu.pipeline_mode<synchronous>, transform_indices = @transform_2, window_bounds = array<i64: 232, 128>}, {pipeline_mode = #tpu.pipeline_mode<synchronous>, transform_indices = @transform_3, window_bounds = array<i64: 16, 32>}]} {
    %c0 = arith.constant 0 : index
    %c0_0 = arith.constant 0 : index
    %0 = vector.load %arg1[%c0, %c0_0] : memref<16x32xf32, #tpu.memory_space<vmem>>, vector<16x32xf32>
    %c0_1 = arith.constant 0 : index
    %c0_2 = arith.constant 0 : index
    %1 = vector.load %arg2[%c0_1, %c0_2] : memref<16x64xf32, #tpu.memory_space<vmem>>, vector<16x64xf32>
    %c0_3 = arith.constant 0 : index
    %c0_4 = arith.constant 0 : index
    %2 = vector.load %arg3[%c0_3, %c0_4] : memref<232x128xf32, #tpu.memory_space<vmem>>, vector<32x96xf32>
    %c32 = arith.constant 32 : index
    %c0_5 = arith.constant 0 : index
    %3 = vector.load %arg3[%c32, %c0_5] : memref<232x128xf32, #tpu.memory_space<vmem>>, vector<1x96xf32>
    %c40 = arith.constant 40 : index
    %c0_6 = arith.constant 0 : index
    %4 = vector.load %arg3[%c40, %c0_6] : memref<232x128xf32, #tpu.memory_space<vmem>>, vector<32x32xf32>
    %c33 = arith.constant 33 : index
    %c0_7 = arith.constant 0 : index
    %5 = vector.load %arg3[%c33, %c0_7] : memref<232x128xf32, #tpu.memory_space<vmem>>, vector<1x32xf32>
    %c34 = arith.constant 34 : index
    %c0_8 = arith.constant 0 : index
    %6 = vector.load %arg3[%c34, %c0_8] : memref<232x128xf32, #tpu.memory_space<vmem>>, vector<1x32xf32>
    %c35 = arith.constant 35 : index
    %c0_9 = arith.constant 0 : index
    %7 = vector.load %arg3[%c35, %c0_9] : memref<232x128xf32, #tpu.memory_space<vmem>>, vector<1x32xf32>
    %c72 = arith.constant 72 : index
    %c0_10 = arith.constant 0 : index
    %8 = vector.load %arg3[%c72, %c0_10] : memref<232x128xf32, #tpu.memory_space<vmem>>, vector<32x32xf32>
    %c36 = arith.constant 36 : index
    %c0_11 = arith.constant 0 : index
    %9 = vector.load %arg3[%c36, %c0_11] : memref<232x128xf32, #tpu.memory_space<vmem>>, vector<1x32xf32>
    %c37 = arith.constant 37 : index
    %c0_12 = arith.constant 0 : index
    %10 = vector.load %arg3[%c37, %c0_12] : memref<232x128xf32, #tpu.memory_space<vmem>>, vector<1x32xf32>
    %c38 = arith.constant 38 : index
    %c0_13 = arith.constant 0 : index
    %11 = vector.load %arg3[%c38, %c0_13] : memref<232x128xf32, #tpu.memory_space<vmem>>, vector<1x32xf32>
    %c104 = arith.constant 104 : index
    %c0_14 = arith.constant 0 : index
    %12 = vector.load %arg3[%c104, %c0_14] : memref<232x128xf32, #tpu.memory_space<vmem>>, vector<64x32xf32>
    %c168 = arith.constant 168 : index
    %c0_15 = arith.constant 0 : index
    %13 = vector.load %arg3[%c168, %c0_15] : memref<232x128xf32, #tpu.memory_space<vmem>>, vector<64x64xf32>
    %cst = arith.constant dense<0.000000e+00> : vector<16x96xf32>
    %14 = tpu.matmul %0, %2, %cst {dimension_numbers = #tpu.dot_dimension_numbers<[1], [0], [0], [1], [0, 0, 1, 1], [], []>} : vector<16x32xf32>, vector<32x96xf32>, vector<16x96xf32> -> vector<16x96xf32>
    %15 = vector.broadcast %3 : vector<1x96xf32> to vector<16x96xf32>
    %16 = arith.addf %14, %15 : vector<16x96xf32>
    %17 = vector.extract_strided_slice %16 {offsets = [0, 0], sizes = [16, 32], strides = [1, 1]} : vector<16x96xf32> to vector<16x32xf32>
    %18 = vector.extract_strided_slice %16 {offsets = [0, 32], sizes = [16, 32], strides = [1, 1]} : vector<16x96xf32> to vector<16x32xf32>
    %19 = vector.extract_strided_slice %16 {offsets = [0, 64], sizes = [16, 32], strides = [1, 1]} : vector<16x96xf32> to vector<16x32xf32>
    %20 = tpu.concatenate %18, %18, %18, %18 in 0 : vector<16x32xf32>, vector<16x32xf32>, vector<16x32xf32>, vector<16x32xf32> -> vector<64x32xf32>
    %21 = arith.mulf %20, %12 : vector<64x32xf32>
    %22 = tpu.concatenate %19, %19, %19, %19 in 0 : vector<16x32xf32>, vector<16x32xf32>, vector<16x32xf32>, vector<16x32xf32> -> vector<64x32xf32>
    %23 = arith.mulf %22, %12 : vector<64x32xf32>
    %cst_16 = arith.constant dense<0.000000e+00> : vector<16x64xf32>
    %24 = tpu.matmul %17, %21, %cst_16 {dimension_numbers = #tpu.dot_dimension_numbers<[1], [1], [0], [0], [0, 0, 1, 0], [], []>} : vector<16x32xf32>, vector<64x32xf32>, vector<16x64xf32> -> vector<16x64xf32>
    %cst_17 = arith.constant 0.353553385 : f32
    %25 = vector.broadcast %cst_17 : f32 to vector<16x64xf32>
    %26 = arith.mulf %24, %25 : vector<16x64xf32>
    %27 = arith.addf %26, %1 : vector<16x64xf32>
    %cst_18 = arith.constant dense<0xFF800000> : vector<16xf32>
    %28 = vector.multi_reduction <maximumf>, %27, %cst_18 [1] : vector<16x64xf32> to vector<16xf32>
    %29 = vector.shape_cast %28 : vector<16xf32> to vector<16x1xf32>
    %30 = vector.broadcast %29 : vector<16x1xf32> to vector<16x64xf32>
    %31 = arith.subf %27, %30 : vector<16x64xf32>
    %32 = math.exp %31 : vector<16x64xf32>
    %cst_19 = arith.constant dense<0.000000e+00> : vector<16x64xf32>
    %33 = tpu.matmul %32, %13, %cst_19 {dimension_numbers = #tpu.dot_dimension_numbers<[1], [0], [0], [1], [0, 0, 1, 1], [], []>} : vector<16x64xf32>, vector<64x64xf32>, vector<16x64xf32> -> vector<16x64xf32>
    %cst_20 = arith.constant 1.000000e-30 : f32
    %34 = vector.broadcast %cst_20 : f32 to vector<16x64xf32>
    %35 = arith.maximumf %33, %34 : vector<16x64xf32>
    %36 = tpu.reciprocal %35 {approx = true} : vector<16x64xf32> -> vector<16x64xf32>
    %37 = arith.mulf %32, %36 : vector<16x64xf32>
    %cst_21 = arith.constant dense<0.000000e+00> : vector<16x32xf32>
    %38 = tpu.matmul %37, %23, %cst_21 {dimension_numbers = #tpu.dot_dimension_numbers<[1], [0], [0], [1], [0, 0, 1, 1], [], []>} : vector<16x64xf32>, vector<64x32xf32>, vector<16x32xf32> -> vector<16x32xf32>
    %cst_22 = arith.constant dense<0.000000e+00> : vector<16x32xf32>
    %39 = tpu.matmul %38, %4, %cst_22 {dimension_numbers = #tpu.dot_dimension_numbers<[1], [0], [0], [1], [0, 0, 1, 1], [], []>} : vector<16x32xf32>, vector<32x32xf32>, vector<16x32xf32> -> vector<16x32xf32>
    %40 = vector.broadcast %5 : vector<1x32xf32> to vector<16x32xf32>
    %41 = arith.addf %39, %40 : vector<16x32xf32>
    %42 = arith.addf %41, %0 : vector<16x32xf32>
    %cst_23 = arith.constant dense<0.000000e+00> : vector<16xf32>
    %43 = vector.multi_reduction <add>, %42, %cst_23 [1] : vector<16x32xf32> to vector<16xf32>
    %44 = vector.shape_cast %43 : vector<16xf32> to vector<16x1xf32>
    %cst_24 = arith.constant 3.200000e+01 : f32
    %45 = vector.broadcast %cst_24 : f32 to vector<16x1xf32>
    %46 = arith.divf %44, %45 : vector<16x1xf32>
    %47 = vector.broadcast %46 : vector<16x1xf32> to vector<16x32xf32>
    %48 = arith.subf %42, %47 : vector<16x32xf32>
    %49 = vector.broadcast %46 : vector<16x1xf32> to vector<16x32xf32>
    %50 = arith.subf %42, %49 : vector<16x32xf32>
    %51 = arith.mulf %48, %50 : vector<16x32xf32>
    %cst_25 = arith.constant dense<0.000000e+00> : vector<16xf32>
    %52 = vector.multi_reduction <add>, %51, %cst_25 [1] : vector<16x32xf32> to vector<16xf32>
    %53 = vector.shape_cast %52 : vector<16xf32> to vector<16x1xf32>
    %cst_26 = arith.constant 3.200000e+01 : f32
    %54 = vector.broadcast %cst_26 : f32 to vector<16x1xf32>
    %55 = arith.divf %53, %54 : vector<16x1xf32>
    %56 = vector.broadcast %46 : vector<16x1xf32> to vector<16x32xf32>
    %57 = arith.subf %42, %56 : vector<16x32xf32>
    %cst_27 = arith.constant 9.99999974E-6 : f32
    %58 = vector.broadcast %cst_27 : f32 to vector<16x1xf32>
    %59 = arith.addf %55, %58 : vector<16x1xf32>
    %60 = math.rsqrt %59 : vector<16x1xf32>
    %61 = vector.broadcast %60 : vector<16x1xf32> to vector<16x32xf32>
    %62 = arith.mulf %57, %61 : vector<16x32xf32>
    %63 = vector.broadcast %6 : vector<1x32xf32> to vector<16x32xf32>
    %64 = arith.mulf %62, %63 : vector<16x32xf32>
    %65 = vector.broadcast %7 : vector<1x32xf32> to vector<16x32xf32>
    %66 = arith.addf %64, %65 : vector<16x32xf32>
    %cst_28 = arith.constant dense<0.000000e+00> : vector<16x32xf32>
    %67 = tpu.matmul %66, %8, %cst_28 {dimension_numbers = #tpu.dot_dimension_numbers<[1], [0], [0], [1], [0, 0, 1, 1], [], []>} : vector<16x32xf32>, vector<32x32xf32>, vector<16x32xf32> -> vector<16x32xf32>
    %68 = vector.broadcast %9 : vector<1x32xf32> to vector<16x32xf32>
    %69 = arith.addf %67, %68 : vector<16x32xf32>
    %cst_29 = arith.constant 0.000000e+00 : f32
    %70 = vector.broadcast %cst_29 : f32 to vector<16x32xf32>
    %71 = arith.maximumf %69, %70 : vector<16x32xf32>
    %72 = arith.addf %66, %71 : vector<16x32xf32>
    %cst_30 = arith.constant dense<0.000000e+00> : vector<16xf32>
    %73 = vector.multi_reduction <add>, %72, %cst_30 [1] : vector<16x32xf32> to vector<16xf32>
    %74 = vector.shape_cast %73 : vector<16xf32> to vector<16x1xf32>
    %cst_31 = arith.constant 3.200000e+01 : f32
    %75 = vector.broadcast %cst_31 : f32 to vector<16x1xf32>
    %76 = arith.divf %74, %75 : vector<16x1xf32>
    %77 = vector.broadcast %76 : vector<16x1xf32> to vector<16x32xf32>
    %78 = arith.subf %72, %77 : vector<16x32xf32>
    %79 = vector.broadcast %76 : vector<16x1xf32> to vector<16x32xf32>
    %80 = arith.subf %72, %79 : vector<16x32xf32>
    %81 = arith.mulf %78, %80 : vector<16x32xf32>
    %cst_32 = arith.constant dense<0.000000e+00> : vector<16xf32>
    %82 = vector.multi_reduction <add>, %81, %cst_32 [1] : vector<16x32xf32> to vector<16xf32>
    %83 = vector.shape_cast %82 : vector<16xf32> to vector<16x1xf32>
    %cst_33 = arith.constant 3.200000e+01 : f32
    %84 = vector.broadcast %cst_33 : f32 to vector<16x1xf32>
    %85 = arith.divf %83, %84 : vector<16x1xf32>
    %86 = vector.broadcast %76 : vector<16x1xf32> to vector<16x32xf32>
    %87 = arith.subf %72, %86 : vector<16x32xf32>
    %cst_34 = arith.constant 9.99999974E-6 : f32
    %88 = vector.broadcast %cst_34 : f32 to vector<16x1xf32>
    %89 = arith.addf %85, %88 : vector<16x1xf32>
    %90 = math.rsqrt %89 : vector<16x1xf32>
    %91 = vector.broadcast %90 : vector<16x1xf32> to vector<16x32xf32>
    %92 = arith.mulf %87, %91 : vector<16x32xf32>
    %93 = vector.broadcast %10 : vector<1x32xf32> to vector<16x32xf32>
    %94 = arith.mulf %92, %93 : vector<16x32xf32>
    %95 = vector.broadcast %11 : vector<1x32xf32> to vector<16x32xf32>
    %96 = arith.addf %94, %95 : vector<16x32xf32>
    %c0_35 = arith.constant 0 : index
    %c0_36 = arith.constant 0 : index
    %97 = vector.load %arg4[%c0_35, %c0_36] : memref<16x32xf32, #tpu.memory_space<vmem>>, vector<16x32xf32>
    tpu.vector_store %arg4[%c0_35, %c0_36], %96 {strides = array<i32>} : memref<16x32xf32, #tpu.memory_space<vmem>>, vector<16x32xf32>,
    return
  }
  func.func @transform_0(%arg0: i32) -> (i32, i32) {
    %c0_i32 = arith.constant 0 : i32
    %c0_i32_0 = arith.constant 0 : i32
    %c0_i32_1 = arith.constant 0 : i32
    return %c0_i32, %c0_i32_0 : i32, i32
  }
  func.func @transform_1(%arg0: i32) -> (i32, i32) {
    %c0_i32 = arith.constant 0 : i32
    %c0_i32_0 = arith.constant 0 : i32
    %c0_i32_1 = arith.constant 0 : i32
    return %c0_i32, %c0_i32_0 : i32, i32
  }
  func.func @transform_2(%arg0: i32) -> (i32, i32) {
    %c0_i32 = arith.constant 0 : i32
    %c0_i32_0 = arith.constant 0 : i32
    %c0_i32_1 = arith.constant 0 : i32
    return %c0_i32, %c0_i32_0 : i32, i32
  }
  func.func @transform_3(%arg0: i32) -> (i32, i32) {
    %c0_i32 = arith.constant 0 : i32
    %c0_i32_0 = arith.constant 0 : i32
    %c0_i32_1 = arith.constant 0 : i32
    return %c0_i32, %c0_i32_0 : i32, i32
  }
}

</mosaic_0001>

<bundles_post_ra>
// kernel: transformer_layer.1
= control target key start
LH: loop header
LB: loop body
LE: loop exit
PB: predicated region body
PF: predicated region fallthrough
CT: control target
= control target key end

     0   :  { %vm58_vm0 = vcmask 261120   ;;  %s1030_s24 = smov 32   ;;  %s1294_s0 = inlined_call_operand.vmem [shape: f32[16,32], index: 0, kind: input, shape index: {}]   ;;  %s1295_s1 = inlined_call_operand.vmem [shape: f32[16,64], index: 1, kind: input, shape index: {}]   ;;  %s1296_s2 = inlined_call_operand.vmem [shape: f32[232,128], index: 2, kind: input, shape index: {}]   ;;  %s1297_s3 = inlined_call_operand.hbm [shape: f32[16,32], index: 3, kind: output, shape index: {}]  }
   0x1   :  { %v22_v0 = vld [vmem:[%s1296_s2 + $0x18] sm:$0xff]  ;;  %v21_v1 = vld [vmem:[%s1296_s2 + $0x10] sm:$0xff]  ;;  %v1065_v2 = vld [vmem:[%s1294_s0] sm:$0xff] }
   0x2   :  { %896 = vmatprep.subr.mxu0 %v22_v0  ;;  %v20_v3 = vld [vmem:[%s1296_s2 + $0x8] sm:$0xff]  ;;  %904 = vmatprep.mubr.msk.f32.mxu0 %vm58_vm0, %v1065_v2  ;;  %v1075_v4 = vld [vmem:[%s1296_s2 + $0xa0] sm:$0xff]  ;;  %v1080_v5 = vld [vmem:[%s1296_s2 + $0x90] sm:$0xff] }
   0x3   :  { %897 = vmatpush3.msra.mxu0 %v22_v0  ;;  %162 = vrot.lane.b32.xlu0 %v1075_v4, %s1030_s24  ;;  %v19_v6 = vld [vmem:[%s1296_s2] sm:$0xff]  ;;  %v1090_v7 = vld [vmem:[%s1296_s2 + $0x98] sm:$0xff] }
   0x4   :  { %898 = vmatprep.subr.mxu0 %v21_v1  ;;  %158 = vrot.lane.b32.xlu1 %v1080_v5, %s1030_s24 }
   0x5   :  { %899 = vmatpush3.msra.mxu0 %v21_v1 }
   0x6   :  { %8 = vsyncpa [#allocation3], 0  ;;  %900 = vmatprep.subr.mxu0 %v20_v3  ;;  %v1095_v8 = vld [vmem:[%s1296_s2 + $0x88] sm:$0xff]  ;;  %v1107_v10 = vld [vmem:[%s1296_s2 + $0x80] sm:$0xff]  ;;  %s1031_s15 = smov 96   ;;  %vm337_vm1 = vcmask 523264  }
   0x7   :  { %901 = vmatpush3.msra.mxu0 %v20_v3  ;;  %v1100_v9 = vld [vmem:[%s1294_s0 + $0x8] sm:$0xff]  ;;  %160 = vrot.lane.b32.xlu0 %v1090_v7, %s1030_s24  ;;  %v1114_v11 = vld [vmem:[%s1296_s2 + $0x78] sm:$0xff]  ;;  %v1121_v12 = vld [vmem:[%s1296_s2 + $0x70] sm:$0xff]  ;;  %s1033_s8 = smov [#allocation2]  }
   0x8   :  { %902 = vmatprep.subr.mxu0 %v19_v6  ;;  %156 = vrot.lane.b32.xlu1 %v1095_v8, %s1030_s24  ;;  %v1126_v13 = vld [vmem:[%s1296_s2 + $0x68] sm:$0xff]  ;;  %v821_v16 = vld [vmem:[%s1296_s2 + $0x20] ss:$0 sm:$0xff]  ;;  %v52_v54 = vld [vmem:[%s1296_s2 + $0xd8] sm:$0xff]  ;;  %s810_s9 = sshll.u32 %s1033_s8, 4  ;;  %s811_s9 = int_to_ptr.vmem [resolvable:$true] %s810_s9 }
   0x9   :  { %903 = vmatpush3.msra.mxu0 %v19_v6  ;;  %v18_v44 = vld [vmem:[%s1295_s1 + $0x8] sm:$0xff]  ;;  %v17_v47 = vld [vmem:[%s1295_s1] sm:$0xff]  ;;  %v51_v55 = vld [vmem:[%s1296_s2 + $0xd0] sm:$0xff]  ;;  %s1008_s0 = scalar_lea.vmem %s811_s9, 256  ;;  %p1013_p1 = scmp.lt.s32.totalorder %s811_s9, %s811_s9 }
   0xa   :  { %905 = vmatmul.mubr.msk.f32.vlgmr.msra.gmra.mxu0 %vm58_vm0, %v1100_v9  ;;  %v53_v53 = vld [vmem:[%s1296_s2 + $0xe0] sm:$0xff]  ;;  %v50_v56 = vld [vmem:[%s1296_s2 + $0xc8] sm:$0xff]  ;;  %v48_v58 = vld [vmem:[%s1296_s2 + $0xb8] sm:$0xff]  ;;  %p1009_p0 = scmp.ne.s32.totalorder %s811_s9, %s1008_s0  ;;  %p1014_p2 = scmp.lt.s32.totalorder %s1008_s0, %s1008_s0 }
   0xb   :  { %154 = vrot.lane.b32.xlu0 %v1107_v10, %s1030_s24  ;;  %926 = vmatprep.subr.mxu0 %v53_v53  ;;  %v49_v57 = vld [vmem:[%s1296_s2 + $0xc0] sm:$0xff]  ;;  %v47_v59 = vld [vmem:[%s1296_s2 + $0xb0] sm:$0xff]  ;;  %v46_v60 = vld [vmem:[%s1296_s2 + $0xa8] sm:$0xff] }
   0xc   :  { %152 = vrot.lane.b32.xlu1 %v1114_v11, %s1030_s24  ;;  %927 = vmatpush3.msra.mxu0 %v53_v53  ;;  %p1015_p3 = por %p1014_p2, %p1013_p1 }
   0xd   :  { %928 = vmatprep.subr.mxu0 %v52_v54 }
   0xe   :  { %929 = vmatpush3.msra.mxu0 %v52_v54  ;;  %p1016_p4 = pnand %p1015_p3, %p1009_p0 }
   0xf   :  { %150 = vrot.lane.b32.xlu0 %v1121_v12, %s1030_s24  ;;  %930 = vmatprep.subr.mxu0 %v51_v55 }
  0x10   :  { %148 = vrot.lane.b32.xlu1 %v1126_v13, %s1030_s24  ;;  %s1032_s24 = smov 64   ;;  %931 = vmatpush3.msra.mxu0 %v51_v55 }
  0x11   :  { %932 = vmatprep.subr.mxu0 %v50_v56 }
  0x12   :  { %933 = vmatpush3.msra.mxu0 %v50_v56 }
  0x13   :  { %934 = vmatprep.subr.mxu0 %v49_v57 }
  0x14   :  { %935 = vmatpush3.msra.mxu0 %v49_v57 }
  0x15   :  { %936 = vmatprep.subr.mxu0 %v48_v58 }
  0x16   :  { %937 = vmatpush3.msra.mxu0 %v48_v58 }
  0x17   :  { %938 = vmatprep.subr.mxu0 %v47_v59 }
  0x18   :  { %939 = vmatpush3.msra.mxu0 %v47_v59 }
  0x19   :  { %940 = vmatprep.subr.mxu0 %v46_v60 }
  0x1a   :  { %941 = vmatpush3.msra.mxu0 %v46_v60 }
  0x75   :  { %v163_v14 = vpop.permute.xlu0 %162 }
  0x76   :  { %v159_v15 = vpop.permute.xlu1 %158 }
  0x79   :  { %v161_v17 = vpop.permute.xlu0 %160 }
  0x7a   :  { %v157_v20 = vpop.permute.xlu1 %156 }
  0x7d   :  { %v155_v25 = vpop.permute.xlu0 %154 }
  0x7e   :  { %v153_v27 = vpop.permute.xlu1 %152 }
  0x81   :  { %v151_v30 = vpop.permute.xlu0 %150 }
  0x82   :  { %v149_v32 = vpop.permute.xlu1 %148 }
  0xca   :  { %v906_v18 = vpop.f32.mrf.mxu0 }
  0xcb   :  { %v1133_v19 = vadd.f32 %v906_v18, %v821_v16 }
  0xcc   :  { %v131_v21 = vpop.f32.mrf.mxu0 }
  0xcd   :  { %v1135_v22 = vadd.f32 %v821_v16, %v131_v21  ;;  %v179_v23 = vmul.f32 %v163_v14, %v1133_v19  ;;  %v177_v26 = vmul.f32 %v159_v15, %v1133_v19  ;;  %v175_v29 = vmul.f32 %v155_v25, %v1133_v19  ;;  %v27_v25 = vld [vmem:[%s1296_s2 + $0x40] sm:$0xff] }
  0xce   :  { %v173_v33 = vmul.f32 %v151_v30, %v1133_v19 }
  0xcf   :  { %234 = vrot.lane.b32.xlu0 %v179_v23, %s1031_s15  ;;  %923 = vmatprep.mubr.msk.f32.mxu1 %vm58_vm0, %v1135_v22  ;;  %v178_v24 = vmul.f32 %v161_v17, %v1135_v22  ;;  %v176_v28 = vmul.f32 %v157_v20, %v1135_v22  ;;  %v174_v31 = vmul.f32 %v153_v27, %v1135_v22 }
  0xd0   :  { %v172_v34 = vmul.f32 %v149_v32, %v1135_v22 }
  0xd1   :  { %232 = vrot.lane.b32.xlu1 %v178_v24, %s1031_s15 }
  0xd3   :  { %230 = vrot.lane.b32.xlu0 %v177_v26, %s1031_s15 }
  0xd5   :  { %228 = vrot.lane.b32.xlu1 %v176_v28, %s1031_s15 }
  0xd7   :  { %226 = vrot.lane.b32.xlu0 %v175_v29, %s1031_s15 }
  0xd9   :  { %224 = vrot.lane.b32.xlu1 %v174_v31, %s1031_s15 }
  0xdb   :  { %222 = vrot.lane.b32.xlu0 %v173_v33, %s1031_s15 }
  0xdd   :  { %220 = vrot.lane.b32.xlu1 %v172_v34, %s1031_s15 }
 0x141   :  { %v235_v35 = vpop.permute.xlu0 %234 }
 0x142   :  { %907 = vmatprep.subr.msk.mxu1 %vm58_vm0, %v235_v35 }
 0x143   :  { %908 = vmatpush3.xpose.msk.msra.mxu1 %vm58_vm0, %v235_v35  ;;  %v233_v36 = vpop.permute.xlu1 %232 }
 0x144   :  { %909 = vmatprep.subr.msk.mxu1 %vm58_vm0, %v233_v36 }
 0x145   :  { %v231_v37 = vpop.permute.xlu0 %230 }
 0x147   :  { %910 = vmatpush3.xpose.msk.msra.mxu1 %vm58_vm0, %v233_v36  ;;  %v229_v38 = vpop.permute.xlu1 %228 }
 0x148   :  { %911 = vmatprep.subr.msk.mxu1 %vm58_vm0, %v231_v37 }
 0x149   :  { %v227_v39 = vpop.permute.xlu0 %226 }
 0x14b   :  { %912 = vmatpush3.xpose.msk.msra.mxu1 %vm58_vm0, %v231_v37  ;;  %v225_v40 = vpop.permute.xlu1 %224 }
 0x14c   :  { %913 = vmatprep.subr.msk.mxu1 %vm58_vm0, %v229_v38 }
 0x14d   :  { %v223_v41 = vpop.permute.xlu0 %222 }
 0x14f   :  { %914 = vmatpush3.xpose.msk.msra.mxu1 %vm58_vm0, %v229_v38  ;;  %v221_v42 = vpop.permute.xlu1 %220 }
 0x150   :  { %915 = vmatprep.subr.msk.mxu1 %vm58_vm0, %v227_v39 }
 0x153   :  { %916 = vmatpush3.xpose.msk.msra.mxu1 %vm58_vm0, %v227_v39 }
 0x154   :  { %917 = vmatprep.subr.msk.mxu1 %vm58_vm0, %v225_v40 }
 0x157   :  { %918 = vmatpush3.xpose.msk.msra.mxu1 %vm58_vm0, %v225_v40 }
 0x158   :  { %919 = vmatprep.subr.msk.mxu1 %vm58_vm0, %v223_v41 }
 0x15b   :  { %920 = vmatpush3.xpose.msk.msra.mxu1 %vm58_vm0, %v223_v41  ;;  %v25_v41 = vld [vmem:[%s1296_s2 + $0x30] sm:$0xff] }
 0x15c   :  { %921 = vmatprep.subr.msk.mxu1 %vm58_vm0, %v221_v42 }
 0x15f   :  { %922 = vmatpush3.xpose.msk.msra.mxu1 %vm58_vm0, %v221_v42  ;;  %v24_v42 = vld [vmem:[%s1296_s2 + $0x28] sm:$0xff] }
 0x160   :  { %964 = vmatprep.subr.mxu1 %v27_v25 }
 0x162   :  { %924 = vmatmul.mubr.msk.f32.vlgmr.msra.gmra.mxu1 %vm58_vm0, %v1133_v19 }
 0x163   :  { %965 = vmatpush3.msra.mxu1 %v27_v25 }
 0x222   :  { %v925_v43 = vpop.f32.mrf.mxu1 }
 0x223   :  { %v334_v45 = vmul.f32 0.35355338, %v925_v43 }
 0x224   :  { %v324_v46 = vpop.f32.mrf.mxu1 }
 0x225   :  { %v333_v48 = vmul.f32 0.35355338, %v324_v46  ;;  %v336_v49 = vadd.f32 %v334_v45, %v18_v44  ;;  %v838_v45 = vld [vmem:[%s1296_s2 + $0x21] ss:$0 sm:$0xff] }
 0x227   :  { %v341_v50 = vsel %vm337_vm1, %v336_v49, -inf  ;;  %v335_v51 = vadd.f32 %v333_v48, %v17_v47 }
 0x228   :  { %342 = vmax.xlane.f32.xlu1 %v341_v50 }
 0x229   :  { %v338_v52 = vsel %vm337_vm1, %v335_v51, -inf }
 0x22a   :  { %339 = vmax.xlane.f32.xlu0 %v338_v52 }
 0x239   :  { %192 = vrot.lane.b32.xlu1 %v1090_v7, %s1032_s24 }
 0x23d   :  { %188 = vrot.lane.b32.xlu1 %v1095_v8, %s1032_s24 }
 0x240   :  { %194 = vrot.lane.b32.xlu0 %v1075_v4, %s1032_s24 }
 0x241   :  { %184 = vrot.lane.b32.xlu1 %v1114_v11, %s1032_s24 }
 0x244   :  { %190 = vrot.lane.b32.xlu0 %v1080_v5, %s1032_s24 }
 0x245   :  { %180 = vrot.lane.b32.xlu1 %v1126_v13, %s1032_s24 }
 0x248   :  { %186 = vrot.lane.b32.xlu0 %v1107_v10, %s1032_s24 }
 0x24c   :  { %182 = vrot.lane.b32.xlu0 %v1121_v12, %s1032_s24 }
 0x2b1   :  { %v343_v61 = vpop.xlane.xlu1 %342 }
 0x2b2   :  { %v345_v62 = vsub.f32 %v336_v49, %v343_v61 }
 0x2b3   :  { %v340_v63 = vpop.xlane.xlu0 %339 }
 0x2b4   :  { %v344_v0 = vsub.f32 %v335_v51, %v340_v63  ;;  %v348_v1 = vmul.f32 1.442695, %v345_v62  ;;  %v33_v63 = vld [vmem:[%s1296_s2 + $0x58] sm:$0xff] }
 0x2b5   :  { %v193_v3 = vpop.permute.xlu1 %192 }
 0x2b6   :  { %v346_v4 = vmul.f32 1.442695, %v344_v0  ;;  %v210_v5 = vmul.f32 %v193_v3, %v1135_v22  ;;  %v32_v0 = vld [vmem:[%s1296_s2 + $0x50] sm:$0xff] }
 0x2b7   :  { %v195_v6 = vpop.permute.xlu0 %194 }
 0x2b8   :  { %992 = vpow2.f32 %v346_v4  ;;  %v211_v7 = vmul.f32 %v195_v6, %v1133_v19  ;;  %457 = vrot.lane.b32.xlu1 %v210_v5, %s1032_s24 }
 0x2b9   :  { %994 = vpow2.f32 %v348_v1  ;;  %v189_v8 = vpop.permute.xlu1 %188  ;;  %v31_v1 = vld [vmem:[%s1296_s2 + $0x48] sm:$0xff] }
 0x2ba   :  { %v208_v10 = vmul.f32 %v189_v8, %v1135_v22  ;;  %459 = vrot.lane.b32.xlu0 %v211_v7, %s1032_s24 }
 0x2bb   :  { %v191_v11 = vpop.permute.xlu0 %190 }
 0x2bc   :  { %v209_v12 = vmul.f32 %v191_v11, %v1133_v19  ;;  %453 = vrot.lane.b32.xlu1 %v208_v10, %s1032_s24  ;;  %v841_v11 = vld [vmem:[%s1296_s2 + $0x22] ss:$0 sm:$0xff] }
 0x2bd   :  { %v185_v13 = vpop.permute.xlu1 %184 }
 0x2be   :  { %v206_v14 = vmul.f32 %v185_v13, %v1135_v22  ;;  %455 = vrot.lane.b32.xlu0 %v209_v12, %s1032_s24  ;;  %v842_v13 = vld [vmem:[%s1296_s2 + $0x23] ss:$0 sm:$0xff] }
 0x2bf   :  { %v187_v15 = vpop.permute.xlu0 %186 }
 0x2c0   :  { %v207_v16 = vmul.f32 %v187_v15, %v1133_v19  ;;  %449 = vrot.lane.b32.xlu1 %v206_v14, %s1032_s24 }
 0x2c1   :  { %v181_v17 = vpop.permute.xlu1 %180 }
 0x2c2   :  { %v204_v18 = vmul.f32 %v181_v17, %v1135_v22  ;;  %451 = vrot.lane.b32.xlu0 %v207_v16, %s1032_s24  ;;  %v26_v22 = vld [vmem:[%s1296_s2 + $0x38] sm:$0xff] }
 0x2c3   :  { %v183_v20 = vpop.permute.xlu0 %182  ;;  %966 = vmatprep.subr.mxu1 %v26_v22 }
 0x2c4   :  { %v205_v21 = vmul.f32 %v183_v20, %v1133_v19  ;;  %445 = vrot.lane.b32.xlu1 %v204_v18, %s1032_s24  ;;  %967 = vmatpush3.msra.mxu1 %v26_v22 }
 0x2c5   :  { %v993_v23 = vpop.eup %992  ;;  %968 = vmatprep.subr.mxu1 %v25_v41 }
 0x2c6   :  { %v995_v24 = vpop.eup %994  ;;  %942 = vmatprep.mubr.msk.f32.mxu0 %vm337_vm1, %v993_v23  ;;  %447 = vrot.lane.b32.xlu0 %v205_v21, %s1032_s24  ;;  %v843_v21 = vld [vmem:[%s1296_s2 + $0x24] ss:$0 sm:$0xff] }
 0x2c7   :  { %943 = vmatmul.mubr.msk.f32.vlgmr.msra.gmra.mxu0 %vm337_vm1, %v995_v24  ;;  %969 = vmatpush3.msra.mxu1 %v25_v41 }
 0x2c8   :  { %970 = vmatprep.subr.mxu1 %v24_v42 }
 0x2c9   :  { %971 = vmatpush3.msra.mxu1 %v24_v42 }
 0x32a   :  { %v458_v19 = vpop.permute.xlu1 %457 }
 0x32c   :  { %v460_v26 = vpop.permute.xlu0 %459 }
 0x32d   :  { %945 = vmatprep.subr.mxu0 %v460_v26 }
 0x32e   :  { %v454_v27 = vpop.permute.xlu1 %453  ;;  %946 = vmatpush3.msra.mxu0 %v460_v26 }
 0x32f   :  { %947 = vmatprep.subr.mxu0 %v458_v19 }
 0x330   :  { %948 = vmatpush3.msra.mxu0 %v458_v19  ;;  %v456_v28 = vpop.permute.xlu0 %455 }
 0x331   :  { %949 = vmatprep.subr.mxu0 %v456_v28 }
 0x332   :  { %950 = vmatpush3.msra.mxu0 %v456_v28  ;;  %v450_v29 = vpop.permute.xlu1 %449 }
 0x333   :  { %951 = vmatprep.subr.mxu0 %v454_v27 }
 0x334   :  { %952 = vmatpush3.msra.mxu0 %v454_v27  ;;  %v452_v30 = vpop.permute.xlu0 %451 }
 0x335   :  { %953 = vmatprep.subr.mxu0 %v452_v30 }
 0x336   :  { %954 = vmatpush3.msra.mxu0 %v452_v30  ;;  %v446_v32 = vpop.permute.xlu1 %445 }
 0x337   :  { %955 = vmatprep.subr.mxu0 %v450_v29 }
 0x338   :  { %956 = vmatpush3.msra.mxu0 %v450_v29  ;;  %v448_v31 = vpop.permute.xlu0 %447 }
 0x339   :  { %957 = vmatprep.subr.mxu0 %v448_v31 }
 0x33a   :  { %958 = vmatpush3.msra.mxu0 %v448_v31 }
 0x33b   :  { %959 = vmatprep.subr.mxu0 %v446_v32 }
 0x33c   :  { %960 = vmatpush3.msra.mxu0 %v446_v32 }
 0x387   :  { %v944_v33 = vpop.f32.mrf.mxu0 }
 0x388   :  { %v432_v34 = vmax.f32 %v944_v33, 1e-30 }
 0x389   :  { %v422_v35 = vpop.f32.mrf.mxu0 }
 0x38a   :  { %v431_v36 = vmax.f32 %v422_v35, 1e-30  ;;  %996 = vrcp.f32 %v432_v34 }
 0x38c   :  { %998 = vrcp.f32 %v431_v36 }
 0x397   :  { %v997_v37 = vpop.eup %996 }
 0x398   :  { %v436_v40 = vmul.f32 %v997_v37, %v995_v24 }
 0x399   :  { %v999_v38 = vpop.eup %998 }
 0x39a   :  { %v435_v39 = vmul.f32 %v999_v38, %v993_v23 }
 0x39c   :  { %961 = vmatprep.mubr.msk.f32.mxu0 %vm337_vm1, %v435_v39 }
 0x39d   :  { %962 = vmatmul.mubr.msk.f32.vlgmr.msra.gmra.mxu0 %vm337_vm1, %v436_v40 }
 0x45d   :  { %v963_v43 = vpop.f32.mrf.mxu0 }
 0x45f   :  { %v541_v44 = vpop.f32.mrf.mxu0 }
 0x460   :  { %972 = vmatprep.mubr.msk.f32.mxu1 %vm58_vm0, %v541_v44 }
 0x461   :  { %973 = vmatmul.mubr.msk.f32.vlgmr.msra.gmra.mxu1 %vm58_vm0, %v963_v43 }
 0x521   :  { %v974_v46 = vpop.f32.mrf.mxu1 }
 0x522   :  { %v632_v47 = vadd.f32 %v974_v46, %v838_v45 }
 0x523   :  { %v626_v48 = vpop.f32.mrf.mxu1 }
 0x524   :  { %v627_v49 = vadd.f32 %v838_v45, %v626_v48  ;;  %v636_v50 = vadd.f32 %v632_v47, %v1100_v9  ;;  %v846_v48 = vld [vmem:[%s1296_s2 + $0x25] ss:$0 sm:$0xff] }
 0x526   :  { %v640_v51 = vsel %vm58_vm0, %v636_v50, 0.0  ;;  %v635_v52 = vadd.f32 %v627_v49, %v1065_v2  ;;  %v34_v2 = vld [vmem:[%s1296_s2 + $0x60] sm:$0xff] }
 0x527   :  { %641 = vadd.xlane.f32.xlu1 %v640_v51  ;;  %975 = vmatprep.subr.mxu0 %v34_v2  ;;  %v847_v51 = vld [vmem:[%s1296_s2 + $0x26] ss:$0 sm:$0xff] }
 0x528   :  { %v637_v53 = vsel %vm58_vm0, %v635_v52, 0.0  ;;  %976 = vmatpush3.msra.mxu0 %v34_v2 }
 0x529   :  { %638 = vadd.xlane.f32.xlu0 %v637_v53  ;;  %977 = vmatprep.subr.mxu0 %v33_v63 }
 0x52a   :  { %978 = vmatpush3.msra.mxu0 %v33_v63 }
 0x52b   :  { %979 = vmatprep.subr.mxu0 %v32_v0 }
 0x52c   :  { %980 = vmatpush3.msra.mxu0 %v32_v0 }
 0x52d   :  { %981 = vmatprep.subr.mxu0 %v31_v1 }
 0x52e   :  { %982 = vmatpush3.msra.mxu0 %v31_v1 }
 0x5b0   :  { %v642_v54 = vpop.xlane.xlu1 %641 }
 0x5b1   :  { %v645_v55 = vmul.f32 0.03125, %v642_v54 }
 0x5b2   :  { %v639_v56 = vpop.xlane.xlu0 %638 }
 0x5b3   :  { %v644_v57 = vmul.f32 0.03125, %v639_v56  ;;  %v647_v58 = vsub.f32 %v636_v50, %v645_v55 }
 0x5b5   :  { %v646_v59 = vsub.f32 %v635_v52, %v644_v57  ;;  %v649_v62 = vmul.f32 %v647_v58, %v647_v58 }
 0x5b7   :  { %v648_v60 = vmul.f32 %v646_v59, %v646_v59  ;;  %v653_v9 = vsel %vm58_vm0, %v649_v62, 0.0 }
 0x5b9   :  { %v650_v61 = vsel %vm58_vm0, %v648_v60, 0.0 }
 0x5ba   :  { %651 = vadd.xlane.f32.xlu0 %v650_v61 }
 0x5be   :  { %654 = vadd.xlane.f32.xlu0 %v653_v9 }
 0x643   :  { %v652_v3 = vpop.xlane.xlu0 %651 }
 0x644   :  { %v656_v4 = vmul.f32 0.03125, %v652_v3 }
 0x646   :  { %v658_v5 = vadd.f32 1e-05, %v656_v4 }
 0x647   :  { %v655_v6 = vpop.xlane.xlu0 %654 }
 0x648   :  { %1000 = vrsqrt.f32 %v658_v5  ;;  %v657_v7 = vmul.f32 0.03125, %v655_v6 }
 0x64a   :  { %v659_v8 = vadd.f32 1e-05, %v657_v7 }
 0x64c   :  { %1002 = vrsqrt.f32 %v659_v8 }
 0x655   :  { %v1001_v10 = vpop.eup %1000 }
 0x656   :  { %v662_v12 = vmul.f32 %v1001_v10, %v646_v59 }
 0x658   :  { %v668_v14 = vmul.f32 %v841_v11, %v662_v12 }
 0x659   :  { %v1003_v15 = vpop.eup %1002 }
 0x65a   :  { %v663_v16 = vmul.f32 %v1003_v15, %v647_v58  ;;  %v674_v17 = vadd.f32 %v842_v13, %v668_v14 }
 0x65c   :  { %v669_v18 = vmul.f32 %v841_v11, %v663_v16  ;;  %983 = vmatprep.mubr.msk.f32.mxu0 %vm58_vm0, %v674_v17 }
 0x65e   :  { %v675_v20 = vadd.f32 %v842_v13, %v669_v18 }
 0x660   :  { %984 = vmatmul.mubr.msk.f32.vlgmr.msra.gmra.mxu0 %vm58_vm0, %v675_v20 }
 0x720   :  { %v985_v23 = vpop.f32.mrf.mxu0 }
 0x721   :  { %v758_v24 = vadd.f32 %v985_v23, %v843_v21 }
 0x722   :  { %v752_v25 = vpop.f32.mrf.mxu0 }
 0x723   :  { %v762_v22 = vmax.f32 %v758_v24, 0.0  ;;  %v753_v19 = vadd.f32 %v843_v21, %v752_v25 }
 0x725   :  { %v761_v26 = vmax.f32 %v753_v19, 0.0  ;;  %v764_v27 = vadd.f32 %v762_v22, %v675_v20 }
 0x727   :  { %v768_v28 = vsel %vm58_vm0, %v764_v27, 0.0  ;;  %v763_v29 = vadd.f32 %v761_v26, %v674_v17 }
 0x728   :  { %769 = vadd.xlane.f32.xlu0 %v768_v28 }
 0x729   :  { %v765_v30 = vsel %vm58_vm0, %v763_v29, 0.0 }
 0x72a   :  { %766 = vadd.xlane.f32.xlu1 %v765_v30 }
 0x7b1   :  { %v770_v31 = vpop.xlane.xlu0 %769 }
 0x7b2   :  { %v772_v32 = vmul.f32 0.03125, %v770_v31 }
 0x7b3   :  { %v767_v33 = vpop.xlane.xlu1 %766 }
 0x7b4   :  { %v774_v34 = vsub.f32 %v764_v27, %v772_v32  ;;  %v771_v35 = vmul.f32 0.03125, %v767_v33 }
 0x7b6   :  { %v773_v36 = vsub.f32 %v763_v29, %v771_v35  ;;  %v776_v37 = vmul.f32 %v774_v34, %v774_v34 }
 0x7b8   :  { %v780_v38 = vsel %vm58_vm0, %v776_v37, 0.0  ;;  %v775_v39 = vmul.f32 %v773_v36, %v773_v36 }
 0x7b9   :  { %781 = vadd.xlane.f32.xlu0 %v780_v38 }
 0x7ba   :  { %v777_v40 = vsel %vm58_vm0, %v775_v39, 0.0 }
 0x7bb   :  { %778 = vadd.xlane.f32.xlu1 %v777_v40 }
 0x842   :  { %v782_v41 = vpop.xlane.xlu0 %781 }
 0x843   :  { %v784_v42 = vmul.f32 0.03125, %v782_v41 }
 0x844   :  { %v779_v43 = vpop.xlane.xlu1 %778 }
 0x845   :  { %v786_v44 = vadd.f32 1e-05, %v784_v42  ;;  %v783_v45 = vmul.f32 0.03125, %v779_v43 }
 0x847   :  { %1004 = vrsqrt.f32 %v786_v44  ;;  %v785_v46 = vadd.f32 1e-05, %v783_v45 }
 0x849   :  { %1006 = vrsqrt.f32 %v785_v46 }
 0x854   :  { %v1005_v47 = vpop.eup %1004 }
 0x855   :  { %v790_v49 = vmul.f32 %v1005_v47, %v774_v34 }
 0x856   :  { %v1007_v50 = vpop.eup %1006 }
 0x857   :  { %v789_v52 = vmul.f32 %v1007_v50, %v773_v36  ;;  %v796_v53 = vmul.f32 %v846_v48, %v790_v49 }
 0x859   :  { %v795_v54 = vmul.f32 %v846_v48, %v789_v52  ;;  %v802_v55 = vadd.f32 %v847_v51, %v796_v53 }
 0x85b   :  { %v801_v56 = vadd.f32 %v847_v51, %v795_v54  ;;  %804 = vst.msk [vmem:[#allocation2 + $0x8] sm:$0xff] %vm58_vm0, %v802_v55 }
 0x85d   :  { %803 = vst.msk [vmem:[#allocation2] sm:$0xff] %vm58_vm0, %v801_v56 }
 0x85e   :  { %1019 = shalt.err (!%p1016_p4)
}
 0x85f   :  { %s1034_s2 = smov 128   ;;  %s1035_s10 = smov 8  }
 0x860   :  { %816 = dma.vmem_to_hbm [thread:$0]  %s811_s9, 256, %s1297_s3, [#allocation3], %s1034_s2, %s1034_s2, %s1035_s10  }
 0x861   :  { %1028 = dma.done.wait [#allocation3], 256  }
 0x862   :  { %1029 = vsyncadd [#allocation3], 4294967040 }
 0x863   :  { %820 = vsyncpa [#allocation3], 1 }

</bundles_post_ra>
